<compile_context>
chip_gen: v5e
topology: v5e:2x2
jax: 0.10.0
libtpu: 0.0.40
codegen_flags: <defaults>
</compile_context>

<pallas_src>
import functools

import jax
import jax.numpy as jnp
from jax.experimental import pallas as pl
from jax.experimental.pallas import tpu as pltpu


def _lane_tile(v, reps: int):
    """Repeat `v` (shape (bt, F)) `reps` times along the lane axis.

    Built with O(log reps) self-concats (doubling) instead of `reps` pieces, so the
    lowering is a short chain of lane relayouts even for large padding.
    """
    out = v
    cur = 1
    while cur < reps:
        out = jnp.concatenate([out, out], axis=-1)
        cur *= 2
    return out[:, : reps * v.shape[-1]]


def _decomp_kernel(x_ref, res_ref, trend_ref, *, kernel_size: int, seq_len: int,
                   num_features: int):
    """One batch tile of series decomposition on a lane-flattened [bt, L*F] block.

    x_ref:     (bt, L*F)  input series (seq-major / feature-minor on lanes)
    res_ref:   (bt, L*F)  residual output  (x - trend)
    trend_ref: (bt, L*F)  moving-average trend output
    """
    K = kernel_size
    L = seq_len
    F = num_features
    pad = (K - 1) // 2
    N = L + 2 * pad          # replicate-padded sequence length (== L + K - 1)
    LF = L * F

    # Single load of the block; accumulate in f32 regardless of the input dtype.
    x = x_ref[...].astype(jnp.float32)                      # (bt, L*F)

    # In-register replicate padding: 3-piece concat (front | x | back); the pad*F-wide
    # boundary blocks are built by doubling (O(log pad) concats, F-lane pieces only).
    if pad > 0:
        first = x[:, :F]
        last = x[:, LF - F:]
        xp = jnp.concatenate(
            [_lane_tile(first, pad), x, _lane_tile(last, pad)], axis=-1)  # (bt, N*F)
    else:
        xp = x

    # Sliding-window-K sum via shift-doubling: `pw` holds window sums of width p (a
    # power of two) for every valid start position; `acc` accumulates the set bits of
    # K.  Adds: ceil(log2 K) doublings + popcount(K)-1 combines (vs. K-1 naive).
    def _valid_lanes(w: int) -> int:
        return (N - w + 1) * F

    acc = None
    acc_w = 0
    pw, p = xp, 1
    k = K
    while k:
        if k & 1:
            if acc is None:
                acc, acc_w = pw, p
            else:
                new_w = acc_w + p
                width = _valid_lanes(new_w)
                acc = acc[:, :width] + pw[:, acc_w * F: acc_w * F + width]
                acc_w = new_w
        k >>= 1
        if k:
            width = _valid_lanes(2 * p)
            pw = pw[:, :width] + pw[:, p * F: p * F + width]
            p *= 2

    trend = acc[:, :LF] * jnp.float32(1.0 / K)              # (bt, L*F)

    trend_ref[...] = trend.astype(trend_ref.dtype)
    res_ref[...] = (x - trend).astype(res_ref.dtype)


def _round_up(x: int, m: int) -> int:
    return ((x + m - 1) // m) * m


def _round_down(x: int, m: int) -> int:
    return (x // m) * m


def _vmem_capacity_bytes() -> int:
    try:
        cap = getattr(pltpu.get_tpu_info(), "vmem_capacity_bytes", None)
        if cap:
            return int(cap)
    except Exception:
        pass
    return 64 * 1024 * 1024  # conservative (v7x-sized) fallback


def series_decomposition_block(x: jax.Array, kernel_size: int):
    """Pallas TPU implementation of SeriesDecompositionBlock.forward.

    Args:
      x: [B, L, F] time series.
      kernel_size: odd moving-average window.

    Returns:
      (res, moving_mean), both [B, L, F].
    """
    if kernel_size < 1 or kernel_size % 2 != 1:
        raise ValueError(
            "kernel_size must be odd; the PyTorch module's `res = x - trend` only "
            "type-checks for odd kernel sizes (padding = (K-1)//2).")

    B, L, F = x.shape
    LF = L * F
    itemsize = jnp.dtype(x.dtype).itemsize

    # Dtype-aware sublane multiple: 8 (f32) / 16 (bf16) / 32 (int8).
    sub = max(8, 32 // itemsize)

    # VMEM budget derived from the chip capacity and estimated actual usage:
    # pipelined buffers (2x input + 2x2 outputs) plus ~6 f32 temporaries of padded width.
    vmem_cap = _vmem_capacity_bytes()
    budget = min(int(0.70 * vmem_cap), 96 * 1024 * 1024)
    headroom = 2 * 1024 * 1024
    row_in = LF * itemsize
    row_f32 = (L + kernel_size - 1) * F * 4
    per_row = 6 * row_in + 6 * row_f32

    bt_budget = max(sub, _round_down(max(0, budget - headroom) // per_row, sub))
    target_block = min(4 * 1024 * 1024, budget // 8)   # multi-MiB blocks amortize step overhead
    bt_target = max(sub, _round_down(max(1, target_block // max(1, row_in)), sub))

    Bp0 = _round_up(B, sub)
    bt = min(bt_budget, bt_target, Bp0)

    # Keep the grid >= 2 steps when the batch allows it so the "parallel" axis can be
    # sharded across both v7x TensorCores (irrelevant on 1-TC v5e/v6e).
    if Bp0 // bt < 2 and Bp0 >= 2 * sub:
        bt = max(sub, _round_down(Bp0 // 2, sub))

    # TODO(synk): if a single `sub`-row block still exceeds the VMEM budget (enormous
    # L*F), additionally tile the sequence axis with a pad-sized halo.

    Bp = _round_up(B, bt)
    grid = (Bp // bt,)

    # Free row-major reshape: lanes carry the (seq, feature) product, so loads and
    # stores are lane-dense even when F < 128.  Batch padded to the tile multiple.
    x_flat = x.reshape(B, LF)
    if Bp != B:
        x_flat = jnp.pad(x_flat, ((0, Bp - B), (0, 0)))

    kernel = functools.partial(_decomp_kernel, kernel_size=kernel_size,
                               seq_len=L, num_features=F)

    adds = max(1, kernel_size.bit_length() + bin(kernel_size).count("1"))
    cost = pl.CostEstimate(
        flops=int((adds + 2) * Bp * LF),
        transcendentals=0,
        bytes_accessed=int(3 * Bp * LF * itemsize),   # read x, write res, write trend
    )

    res_flat, trend_flat = pl.pallas_call(
        kernel,
        out_shape=(
            jax.ShapeDtypeStruct((Bp, LF), x.dtype),   # res
            jax.ShapeDtypeStruct((Bp, LF), x.dtype),   # moving_mean
        ),
        grid_spec=pltpu.PrefetchScalarGridSpec(
            num_scalar_prefetch=0,
            grid=grid,
            in_specs=[pl.BlockSpec((bt, LF), lambda b: (b, 0))],
            out_specs=[pl.BlockSpec((bt, LF), lambda b: (b, 0)),
                       pl.BlockSpec((bt, LF), lambda b: (b, 0))],
        ),
        compiler_params=pltpu.CompilerParams(
            dimension_semantics=("parallel",),
            vmem_limit_bytes=int(budget),
        ),
        cost_estimate=cost,
    )(x_flat)

    res = res_flat[:B].reshape(B, L, F)
    trend = trend_flat[:B].reshape(B, L, F)
    return res, trend


def _reference(x, kernel_size):
    """Pure-JAX reference matching the PyTorch module semantics."""
    padding = (kernel_size - 1) // 2
    front = jnp.repeat(x[:, 0:1, :], padding, axis=1)
    end = jnp.repeat(x[:, -1:, :], padding, axis=1)
    xp = jnp.concatenate([front, x, end], axis=1)
    L = x.shape[1]
    trend = sum(xp[:, k:k + L, :] for k in range(kernel_size)) / kernel_size
    return x - trend, trend


if __name__ == "__main__":
    # Case 1: small, odd window.
    B, L, F, K = 2, 16, 8, 5
    x = jax.random.normal(jax.random.PRNGKey(0), (B, L, F), dtype=jnp.float32)
    res, trend = series_decomposition_block(x, K)
    jax.block_until_ready((res, trend))
    res_ref, trend_ref = _reference(x, K)
    assert res.shape == (B, L, F) and trend.shape == (B, L, F)
    assert jnp.allclose(trend, trend_ref, atol=1e-5, rtol=1e-5)
    assert jnp.allclose(res, res_ref, atol=1e-5, rtol=1e-5)
    assert jnp.allclose(res + trend, x, atol=1e-5, rtol=1e-5)

    # Case 2: non-power-of-two window, batch not a sublane multiple.
    B2, L2, F2, K2 = 3, 24, 8, 7
    x2 = jax.random.normal(jax.random.PRNGKey(1), (B2, L2, F2), dtype=jnp.float32)
    res2, trend2 = series_decomposition_block(x2, K2)
    jax.block_until_ready((res2, trend2))
    res2_ref, trend2_ref = _reference(x2, K2)
    assert jnp.allclose(trend2, trend2_ref, atol=1e-5, rtol=1e-5)
    assert jnp.allclose(res2, res2_ref, atol=1e-5, rtol=1e-5)

    # Case 3: multi-step grid (batch padding + megacore split), larger window K=25.
    B3, L3, F3, K3 = 20, 64, 16, 25
    x3 = jax.random.normal(jax.random.PRNGKey(2), (B3, L3, F3), dtype=jnp.float32)
    res3, trend3 = series_decomposition_block(x3, K3)
    jax.block_until_ready((res3, trend3))
    res3_ref, trend3_ref = _reference(x3, K3)
    assert jnp.allclose(trend3, trend3_ref, atol=1e-5, rtol=1e-5)
    assert jnp.allclose(res3, res3_ref, atol=1e-5, rtol=1e-5)

    # Case 4: bf16 input (exercises the dtype-aware sublane multiple of 16).
    B4, L4, F4, K4 = 4, 32, 4, 9
    x4 = jax.random.normal(jax.random.PRNGKey(3), (B4, L4, F4), dtype=jnp.bfloat16)
    res4, trend4 = series_decomposition_block(x4, K4)
    jax.block_until_ready((res4, trend4))
    res4_ref, trend4_ref = _reference(x4.astype(jnp.float32), K4)
    assert jnp.allclose(trend4.astype(jnp.float32), trend4_ref, atol=3e-2, rtol=3e-2)
    assert jnp.allclose(res4.astype(jnp.float32), res4_ref, atol=3e-2, rtol=3e-2)

    print("KERNEL_OK")
</pallas_src>

<mosaic_0001>
module attributes {stable_mosaic.version = 11 : i64} {
  func.func @_decomp_kernel(%arg0: i32, %arg1: memref<8x128xf32, #tpu.memory_space<vmem>>, %arg2: memref<8x128xf32, #tpu.memory_space<vmem>>, %arg3: memref<8x128xf32, #tpu.memory_space<vmem>>) attributes {dimension_semantics = [#tpu.dimension_semantics<parallel>], iteration_bounds = array<i64: 1>, scalar_prefetch = 0 : i64, scratch_operands = 0 : i64, tpu.core_type = #tpu.core_type<tc>, window_params = [{transform_indices = @transform_0, window_bounds = array<i64: 8, 128>}, {transform_indices = @transform_1, window_bounds = array<i64: 8, 128>}, {transform_indices = @transform_2, window_bounds = array<i64: 8, 128>}]} {
    %c0 = arith.constant 0 : index
    %c0_0 = arith.constant 0 : index
    %0 = vector.load %arg1[%c0, %c0_0] : memref<8x128xf32, #tpu.memory_space<vmem>>, vector<8x128xf32>
    %1 = vector.extract_strided_slice %0 {offsets = [0, 0], sizes = [8, 8], strides = [1, 1]} : vector<8x128xf32> to vector<8x8xf32>
    %2 = vector.extract_strided_slice %0 {offsets = [0, 120], sizes = [8, 8], strides = [1, 1]} : vector<8x128xf32> to vector<8x8xf32>
    %3 = tpu.concatenate %1, %1 in 1 : vector<8x8xf32>, vector<8x8xf32> -> vector<8x16xf32>
    %4 = tpu.concatenate %2, %2 in 1 : vector<8x8xf32>, vector<8x8xf32> -> vector<8x16xf32>
    %5 = tpu.concatenate %3, %0, %4 in 1 : vector<8x16xf32>, vector<8x128xf32>, vector<8x16xf32> -> vector<8x160xf32>
    %6 = vector.extract_strided_slice %5 {offsets = [0, 0], sizes = [8, 152], strides = [1, 1]} : vector<8x160xf32> to vector<8x152xf32>
    %7 = vector.extract_strided_slice %5 {offsets = [0, 8], sizes = [8, 152], strides = [1, 1]} : vector<8x160xf32> to vector<8x152xf32>
    %8 = arith.addf %6, %7 : vector<8x152xf32>
    %9 = vector.extract_strided_slice %8 {offsets = [0, 0], sizes = [8, 136], strides = [1, 1]} : vector<8x152xf32> to vector<8x136xf32>
    %10 = vector.extract_strided_slice %8 {offsets = [0, 16], sizes = [8, 136], strides = [1, 1]} : vector<8x152xf32> to vector<8x136xf32>
    %11 = arith.addf %9, %10 : vector<8x136xf32>
    %12 = vector.extract_strided_slice %5 {offsets = [0, 0], sizes = [8, 128], strides = [1, 1]} : vector<8x160xf32> to vector<8x128xf32>
    %13 = vector.extract_strided_slice %11 {offsets = [0, 8], sizes = [8, 128], strides = [1, 1]} : vector<8x136xf32> to vector<8x128xf32>
    %14 = arith.addf %12, %13 : vector<8x128xf32>
    %cst = arith.constant 2.000000e-01 : f32
    %15 = vector.broadcast %cst : f32 to vector<8x128xf32>
    %16 = arith.mulf %14, %15 : vector<8x128xf32>
    %c0_1 = arith.constant 0 : index
    %c0_2 = arith.constant 0 : index
    %17 = vector.load %arg3[%c0_1, %c0_2] : memref<8x128xf32, #tpu.memory_space<vmem>>, vector<8x128xf32>
    tpu.vector_store %arg3[%c0_1, %c0_2], %16 {strides = array<i32>} : memref<8x128xf32, #tpu.memory_space<vmem>>, vector<8x128xf32>,
    %18 = arith.subf %0, %16 : vector<8x128xf32>
    %c0_3 = arith.constant 0 : index
    %c0_4 = arith.constant 0 : index
    %19 = vector.load %arg2[%c0_3, %c0_4] : memref<8x128xf32, #tpu.memory_space<vmem>>, vector<8x128xf32>
    tpu.vector_store %arg2[%c0_3, %c0_4], %18 {strides = array<i32>} : memref<8x128xf32, #tpu.memory_space<vmem>>, vector<8x128xf32>,
    return
  }
  func.func @transform_0(%arg0: i32) -> (i32, i32) {
    %c0_i32 = arith.constant 0 : i32
    %c0_i32_0 = arith.constant 0 : i32
    return %arg0, %c0_i32 : i32, i32
  }
  func.func @transform_1(%arg0: i32) -> (i32, i32) {
    %c0_i32 = arith.constant 0 : i32
    %c0_i32_0 = arith.constant 0 : i32
    return %arg0, %c0_i32 : i32, i32
  }
  func.func @transform_2(%arg0: i32) -> (i32, i32) {
    %c0_i32 = arith.constant 0 : i32
    %c0_i32_0 = arith.constant 0 : i32
    return %arg0, %c0_i32 : i32, i32
  }
}

</mosaic_0001>

<bundles_post_ra>
// kernel: tpu_custom_call.1
= control target key start
LH: loop header
LB: loop body
LE: loop exit
PB: predicated region body
PF: predicated region fallthrough
CT: control target
= control target key end

     0   :  { %8 = vsyncpa [#allocation3], 0  ;;  %s232_s0 = inlined_call_operand.hbm [shape: f32[8,128], index: 0, kind: input, shape index: {}]   ;;  %s233_s1 = inlined_call_operand.hbm [shape: f32[8,128], index: 1, kind: output, shape index: {0}]   ;;  %s234_s2 = inlined_call_operand.hbm [shape: f32[8,128], index: 2, kind: output, shape index: {1}]  }
   0x1   :  { %9 = vsyncpa [#allocation4], 0 }
   0x2   :  { %10 = vsyncpa [#allocation7], 0  ;;  %s16_s11 = sshll.u32 %s232_s0, 4  ;;  %s199_s12 = smov [#allocation2]   ;;  %s17_s11 = int_to_ptr.hbm [resolvable:$true] %s16_s11 }
   0x3   :  { %s18_s13 = sshll.u32 %s199_s12, 4  ;;  %s19_s13 = int_to_ptr.vmem [resolvable:$true] %s18_s13 }
   0x4   :  { %21 = dma.hbm_to_vmem [thread:$0]  %s17_s11, 128, %s19_s13, [#allocation3]  }
   0x5   :  { %193 = dma.done.wait [#allocation3], 128  }
   0x6   :  { %194 = vsyncadd [#allocation3], 4294967168  ;;  %v26_v0 = vld [vmem:[#allocation2] sm:$0xff]  ;;  %s200_s14 = smov 8   ;;  %s201_s15 = smov 16   ;;  %vm31_vm0 = vcmask 64512  }
   0x7   :  { %28 = vrot.lane.b32.xlu0 %v26_v0, %s200_s14  ;;  %vm41_vm1 = vcmask 130048   ;;  %s202_s0 = smov 120   ;;  %vm50_vm2 = vcmask 982016   ;;  %s203_s16 = smov 112   ;;  %vm62_vm3 = vcmask 916480  }
   0x8   :  { %s204_s17 = smov [#allocation6]   ;;  %s99_s21 = sshll.u32 %s234_s2, 4  ;;  %s100_s21 = int_to_ptr.hbm [resolvable:$true] %s99_s21 }
   0x9   :  { %s97_s18 = sshll.u32 %s204_s17, 4  ;;  %s205_s22 = smov [#allocation5]   ;;  %s98_s18 = int_to_ptr.vmem [resolvable:$true] %s97_s18 }
   0xa   :  { %s86_s23 = sshll.u32 %s205_s22, 4  ;;  %s88_s26 = sshll.u32 %s233_s1, 4  ;;  %s87_s23 = int_to_ptr.vmem [resolvable:$true] %s86_s23  ;;  %s89_s26 = int_to_ptr.hbm [resolvable:$true] %s88_s26 }
   0xf   :  { %33 = vrot.lane.b32.xlu0 %v26_v0, %s201_s15 }
  0x79   :  { %v29_v1 = vpop.permute.xlu0 %28 }
  0x7a   :  { %v32_v4 = vsel %vm31_vm0, %v26_v0, %v29_v1 }
  0x81   :  { %v34_v2 = vpop.permute.xlu0 %33 }
  0x82   :  { %v36_v3 = vsel %vm31_vm0, %v29_v1, %v34_v2  ;;  %v42_v5 = vsel %vm41_vm1, %v32_v4, %v34_v2 }
  0x83   :  { %38 = vrot.lane.b32.xlu1 %v36_v3, %s201_s15 }
  0x8b   :  { %46 = vrot.lane.b32.xlu1 %v42_v5, %s202_s0 }
  0xf5   :  { %v39_v6 = vpop.permute.xlu1 %38 }
  0xf6   :  { %v43_v7 = vsel %vm41_vm1, %v34_v2, %v39_v6 }
  0xf7   :  { %48 = vrot.lane.b32.xlu2 %v43_v7, %s202_s0 }
  0xfd   :  { %v47_v8 = vpop.permute.xlu1 %46 }
 0x151   :  { %v49_v9 = vpop.permute.xlu2 %48 }
 0x152   :  { %v51_v10 = vsel %vm50_vm2, %v47_v8, %v49_v9  ;;  %v55_v11 = vadd.f32 %v49_v9, %v43_v7 }
 0x153   :  { %v54_v12 = vadd.f32 %v51_v10, %v42_v5 }
 0x154   :  { %60 = vrot.lane.b32.xlu0 %v55_v11, %s203_s16 }
 0x155   :  { %58 = vrot.lane.b32.xlu2 %v54_v12, %s203_s16 }
 0x1af   :  { %v59_v13 = vpop.permute.xlu2 %58 }
 0x1c6   :  { %v61_v14 = vpop.permute.xlu0 %60 }
 0x1c7   :  { %v63_v15 = vsel %vm62_vm3, %v59_v13, %v61_v14  ;;  %v67_v16 = vadd.f32 %v61_v14, %v55_v11 }
 0x1c8   :  { %v66_v17 = vadd.f32 %v63_v15, %v54_v12 }
 0x1c9   :  { %72 = vrot.lane.b32.xlu2 %v67_v16, %s202_s0 }
 0x1ca   :  { %70 = vrot.lane.b32.xlu1 %v66_v17, %s202_s0 }
 0x223   :  { %v73_v18 = vpop.permute.xlu2 %72 }
 0x23c   :  { %v71_v19 = vpop.permute.xlu1 %70 }
 0x23d   :  { %v74_v20 = vsel %vm50_vm2, %v71_v19, %v73_v18 }
 0x23e   :  { %v76_v21 = vadd.f32 %v74_v20, %v42_v5 }
 0x240   :  { %v77_v22 = vmul.f32 0.2, %v76_v21 }
 0x242   :  { %v79_v23 = vsub.f32 %v26_v0, %v77_v22  ;;  %78 = vst [vmem:[#allocation6] sm:$0xff] %v77_v22 }
 0x243   :  { %102 = dma.vmem_to_hbm [thread:$0]  %s98_s18, 128, %s100_s21, [#allocation7]  }
 0x244   :  { %80 = vst [vmem:[#allocation5] sm:$0xff] %v79_v23 }
 0x245   :  { %91 = dma.vmem_to_hbm [thread:$0]  %s87_s23, 128, %s89_s26, [#allocation4]  }
 0x246   :  { %195 = dma.done.wait [#allocation4], 128  }
 0x247   :  { %196 = vsyncadd [#allocation4], 4294967168 }
 0x248   :  { %197 = dma.done.wait [#allocation7], 128  }
 0x249   :  { %198 = vsyncadd [#allocation7], 4294967168 }
 0x24a   :  { %111 = vsyncpa [#allocation3], 1 }
 0x24b   :  { %112 = vsyncpa [#allocation4], 1 }
 0x24c   :  { %113 = vsyncpa [#allocation7], 1 }

</bundles_post_ra>
